<compile_context>
chip_gen: v6e
topology: v6e:2x2x1
jax: 0.10.0
libtpu: 0.0.40
codegen_flags: <defaults>
</compile_context>

<pallas_src>
import functools

import jax
import jax.numpy as jnp
import numpy as np
from jax import lax
from jax.experimental import pallas as pl
from jax.experimental.pallas import tpu as pltpu


def _round_up(a, b):
    return (a + b - 1) // b * b


def _num_tensorcores():
    """Best-effort TensorCore count of the local device (1 on v5e/v6e, 2 on v7x)."""
    try:
        info = pltpu.get_tpu_info()
        for attr in ("num_tensorcores", "num_cores", "core_count"):
            v = getattr(info, attr, None)
            if v:
                return int(v)
    except Exception:
        pass
    try:
        dev = jax.devices()[0]
        for attr in ("num_cores", "core_count"):
            v = getattr(dev, attr, None)
            if v:
                return int(v)
    except Exception:
        pass
    return 1


def _pick_images_per_step(n, c, c_out, hw, itemsize, n_cores,
                          target_in_bytes=512 * 1024, max_nb=8):
    """Images per grid step: largest divisor of n that
       (a) keeps the per-step input under ~target_in_bytes (DMA sweet spot,
           real/padded bytes - the views are lane dense so logical == padded),
       (b) keeps the unrolled store loop short (max_nb),
       (c) keeps >= 2 grid steps only when the part has >= 2 TensorCores, and
       (d) keeps the second-minor block dims 8-aligned (or full array) so the
           (8, 128) tiling constraint is met without masking."""
    bytes_per_image = c * hw * itemsize
    cap = max(1, min(n, max_nb, target_in_bytes // max(1, bytes_per_image)))
    if n_cores >= 2 and n >= 2:
        cap = min(cap, max(1, n // 2))

    def aligned(nb):
        return ((nb * c) % 8 == 0 or nb == n) and ((nb * c_out) % 8 == 0 or nb == n)

    for nb in range(cap, 0, -1):
        if n % nb == 0 and aligned(nb):
            return nb
    return n  # whole batch in one step: block == full array, always legal.


def _shortcut_kernel(x_ref, sel_ref, o_ref, *, nb, c, c_out, pad):
    # x_ref  : (nb*c,     h*w)      lane-dense input block
    # sel_ref: (h*w,      hw_out)   constant 0/1 selection, resident in VMEM
    # o_ref  : (nb*c_out, hw_out)   lane-dense output block
    z = jnp.dot(
        x_ref[...], sel_ref[...],
        preferred_element_type=jnp.float32,
        # HIGHEST keeps the f32 activations bit-exact through the MXU (sel is
        # 0/1 -> the matmul is an exact selection).  Extra MXU passes are
        # hidden under the dominant HBM DMA.
        precision=lax.Precision.HIGHEST,
    ).astype(o_ref.dtype)

    if pad == 0:
        o_ref[...] = z
        return

    hw_out = o_ref.shape[-1]
    zeros_strip = jnp.zeros((pad, hw_out), o_ref.dtype)
    # nb <= 8 and the body is just three static-slice stores per image
    # (no matmul / concatenate), so this unrolled loop is cheap.
    for b in range(nb):
        ob = b * c_out
        o_ref[ob:ob + pad, :] = zeros_strip
        o_ref[ob + pad:ob + pad + c, :] = z[b * c:(b + 1) * c, :]
        o_ref[ob + pad + c:ob + c_out, :] = zeros_strip


@functools.partial(jax.jit, static_argnums=(1,))
def lambda_layer(x_nchw, planes):
    """Pallas TPU implementation of the bin_resnetv2 LambdaLayer shortcut.

    Equivalent PyTorch:
        F.pad(x[:, :, ::2, ::2], (0, 0, 0, 0, planes//4, planes//4))
    """
    n, c, h, w = x_nchw.shape
    assert h % 2 == 0 and w % 2 == 0, "stride-2 shortcut expects even H and W"
    pad = planes // 4
    h_out, w_out = h // 2, w // 2
    c_out = c + 2 * pad
    hw, hw_out = h * w, h_out * w_out

    # Free (contiguous regrouping) view: lanes carry the flattened spatial dim.
    x_view = x_nchw.reshape(n * c, hw)

    # 0/1 selection matrix, built once on host (constant under jit):
    # sel[k, m] = 1 iff k = (2*io)*w + 2*jo with m = io*w_out + jo,
    # i.e. x_flat @ sel == flatten(x[:, ::2, ::2]).
    m = np.arange(hw_out)
    src = 2 * (m // w_out) * w + 2 * (m % w_out)
    sel_np = np.zeros((hw, hw_out), dtype=np.float32)
    sel_np[src, m] = 1.0
    sel = jnp.asarray(sel_np, dtype=x_nchw.dtype)

    itemsize = jnp.dtype(x_nchw.dtype).itemsize
    nb = _pick_images_per_step(n, c, c_out, hw, itemsize, _num_tensorcores())
    grid = (n // nb,)

    # Real (padded, double-buffered) VMEM footprint of one grid step.
    in_tile = _round_up(nb * c, 8) * _round_up(hw, 128) * itemsize
    out_tile = _round_up(nb * c_out, 8) * _round_up(hw_out, 128) * itemsize
    sel_tile = _round_up(hw, 8) * _round_up(hw_out, 128) * itemsize
    vmem_limit = int(max(16 << 20, 2 * (in_tile + out_tile + sel_tile) + (1 << 20)))

    kernel = functools.partial(_shortcut_kernel, nb=nb, c=c, c_out=c_out, pad=pad)

    out_view = pl.pallas_call(
        kernel,
        out_shape=jax.ShapeDtypeStruct((n * c_out, hw_out), x_nchw.dtype),
        grid=grid,
        in_specs=[
            pl.BlockSpec((nb * c, hw), lambda g: (g, 0)),
            pl.BlockSpec((hw, hw_out), lambda g: (0, 0)),  # constant -> resident
        ],
        out_specs=pl.BlockSpec((nb * c_out, hw_out), lambda g: (g, 0)),
        compiler_params=pltpu.CompilerParams(
            dimension_semantics=("parallel",),
            vmem_limit_bytes=vmem_limit,
        ),
        cost_estimate=pl.CostEstimate(
            flops=0,
            transcendentals=0,
            bytes_accessed=(n * c * hw + n * c_out * hw_out + hw * hw_out) * itemsize,
        ),
    )(x_view, sel)

    # Free (contiguous regrouping) view back to NCHW.
    return out_view.reshape(n, c_out, h_out, w_out)


if __name__ == "__main__":
    # Small shapes consistent with the module's use in a CIFAR ResNet block:
    # batch=2, in_channels=4, spatial=16x16, planes=8 (=> pad planes//4=2/side).
    key = jax.random.PRNGKey(0)
    x = jax.random.normal(key, (2, 4, 16, 16), dtype=jnp.float32)
    planes = 8

    out = jax.block_until_ready(lambda_layer(x, planes))

    # Pure-JAX reference of the same lambda (NCHW semantics, like PyTorch).
    pad = planes // 4
    ref = jnp.pad(x[:, :, ::2, ::2], ((0, 0), (pad, pad), (0, 0), (0, 0)))

    assert out.shape == ref.shape, (out.shape, ref.shape)
    np.testing.assert_allclose(np.asarray(out), np.asarray(ref),
                               rtol=1e-6, atol=1e-6)

    print("KERNEL_OK")
</pallas_src>

<mosaic_0001>
module attributes {stable_mosaic.version = 11 : i64} {
  func.func @_shortcut_kernel(%arg0: i32, %arg1: memref<8x256xf32, #tpu.memory_space<vmem>>, %arg2: memref<256x64xf32, #tpu.memory_space<vmem>>, %arg3: memref<16x64xf32, #tpu.memory_space<vmem>>) attributes {dimension_semantics = [#tpu.dimension_semantics<parallel>], iteration_bounds = array<i64: 1>, scalar_prefetch = 0 : i64, scratch_operands = 0 : i64, tpu.core_type = #tpu.core_type<tc>, window_params = [{transform_indices = @transform_0, window_bounds = array<i64: 8, 256>}, {pipeline_mode = #tpu.pipeline_mode<synchronous>, transform_indices = @transform_1, window_bounds = array<i64: 256, 64>}, {transform_indices = @transform_2, window_bounds = array<i64: 16, 64>}]} {
    %c0 = arith.constant 0 : index
    %c0_0 = arith.constant 0 : index
    %0 = vector.load %arg1[%c0, %c0_0] : memref<8x256xf32, #tpu.memory_space<vmem>>, vector<8x256xf32>
    %c0_1 = arith.constant 0 : index
    %c0_2 = arith.constant 0 : index
    %1 = vector.load %arg2[%c0_1, %c0_2] : memref<256x64xf32, #tpu.memory_space<vmem>>, vector<256x64xf32>
    %cst = arith.constant dense<0.000000e+00> : vector<8x64xf32>
    %2 = tpu.matmul %0, %1, %cst {dimension_numbers = #tpu.dot_dimension_numbers<[1], [0], [0], [1], [0, 0, 1, 1], [], []>, precision = #tpu.contract_precision<fp32>} : vector<8x256xf32>, vector<256x64xf32>, vector<8x64xf32> -> vector<8x64xf32>
    %cst_3 = arith.constant 0.000000e+00 : f32
    %3 = vector.broadcast %cst_3 : f32 to vector<2x64xf32>
    %c0_4 = arith.constant 0 : index
    %c0_5 = arith.constant 0 : index
    %4 = vector.load %arg3[%c0_4, %c0_5] : memref<16x64xf32, #tpu.memory_space<vmem>>, vector<2x64xf32>
    tpu.vector_store %arg3[%c0_4, %c0_5], %3 {strides = array<i32>} : memref<16x64xf32, #tpu.memory_space<vmem>>, vector<2x64xf32>,
    %5 = vector.extract_strided_slice %2 {offsets = [0, 0], sizes = [4, 64], strides = [1, 1]} : vector<8x64xf32> to vector<4x64xf32>
    %c2 = arith.constant 2 : index
    %c0_6 = arith.constant 0 : index
    %6 = vector.load %arg3[%c2, %c0_6] : memref<16x64xf32, #tpu.memory_space<vmem>>, vector<4x64xf32>
    tpu.vector_store %arg3[%c2, %c0_6], %5 {strides = array<i32>} : memref<16x64xf32, #tpu.memory_space<vmem>>, vector<4x64xf32>,
    %c6 = arith.constant 6 : index
    %c0_7 = arith.constant 0 : index
    %7 = vector.load %arg3[%c6, %c0_7] : memref<16x64xf32, #tpu.memory_space<vmem>>, vector<2x64xf32>
    tpu.vector_store %arg3[%c6, %c0_7], %3 {strides = array<i32>} : memref<16x64xf32, #tpu.memory_space<vmem>>, vector<2x64xf32>,
    %c8 = arith.constant 8 : index
    %c0_8 = arith.constant 0 : index
    %8 = vector.load %arg3[%c8, %c0_8] : memref<16x64xf32, #tpu.memory_space<vmem>>, vector<2x64xf32>
    tpu.vector_store %arg3[%c8, %c0_8], %3 {strides = array<i32>} : memref<16x64xf32, #tpu.memory_space<vmem>>, vector<2x64xf32>,
    %9 = vector.extract_strided_slice %2 {offsets = [4, 0], sizes = [4, 64], strides = [1, 1]} : vector<8x64xf32> to vector<4x64xf32>
    %c10 = arith.constant 10 : index
    %c0_9 = arith.constant 0 : index
    %10 = vector.load %arg3[%c10, %c0_9] : memref<16x64xf32, #tpu.memory_space<vmem>>, vector<4x64xf32>
    tpu.vector_store %arg3[%c10, %c0_9], %9 {strides = array<i32>} : memref<16x64xf32, #tpu.memory_space<vmem>>, vector<4x64xf32>,
    %c14 = arith.constant 14 : index
    %c0_10 = arith.constant 0 : index
    %11 = vector.load %arg3[%c14, %c0_10] : memref<16x64xf32, #tpu.memory_space<vmem>>, vector<2x64xf32>
    tpu.vector_store %arg3[%c14, %c0_10], %3 {strides = array<i32>} : memref<16x64xf32, #tpu.memory_space<vmem>>, vector<2x64xf32>,
    return
  }
  func.func @transform_0(%arg0: i32) -> (i32, i32) {
    %c0_i32 = arith.constant 0 : i32
    %c0_i32_0 = arith.constant 0 : i32
    return %arg0, %c0_i32 : i32, i32
  }
  func.func @transform_1(%arg0: i32) -> (i32, i32) {
    %c0_i32 = arith.constant 0 : i32
    %c0_i32_0 = arith.constant 0 : i32
    %c0_i32_1 = arith.constant 0 : i32
    return %c0_i32, %c0_i32_0 : i32, i32
  }
  func.func @transform_2(%arg0: i32) -> (i32, i32) {
    %c0_i32 = arith.constant 0 : i32
    %c0_i32_0 = arith.constant 0 : i32
    return %arg0, %c0_i32 : i32, i32
  }
}

</mosaic_0001>

<bundles_post_ra>
// kernel: lambda_layer.1
= control target key start
LH: loop header
LB: loop body
LE: loop exit
PB: predicated region body
PF: predicated region fallthrough
CT: control target
= control target key end

     0   :  { %7 = vsyncpa [#allocation3], 0  ;;  %s1171_s9 = smov [#allocation2]   ;;  %s1819_s0 = inlined_call_operand.vmem [shape: f32[8,256], index: 0, kind: input, shape index: {}]   ;;  %s1820_s1 = inlined_call_operand.hbm [shape: f32[256,64], index: 1, kind: input, shape index: {}]   ;;  %s1821_s2 = inlined_call_operand.vmem [shape: f32[16,64], index: 2, kind: output, shape index: {}]  }
   0x1   :  { %s15_s10 = sshll.u32 %s1171_s9, 4  ;;  %s16_s10 = int_to_ptr.vmem [resolvable:$true] %s15_s10 }
   0x2   :  { %s1157_s11 = scalar_lea.vmem %s16_s10, 4096  ;;  %p1162_p1 = scmp.lt.s32.totalorder %s16_s10, %s16_s10 }
   0x3   :  { %p1158_p0 = scmp.ne.s32.totalorder %s16_s10, %s1157_s11  ;;  %p1163_p2 = scmp.lt.s32.totalorder %s1157_s11, %s1157_s11 }
   0x5   :  { %p1164_p3 = por %p1163_p2, %p1162_p1 }
   0x7   :  { %p1165_p4 = pnand %p1164_p3, %p1158_p0 }
   0x9   :  { %1168 = shalt.err (!%p1165_p4)
}
   0xa   :  { %s1172_s12 = smov 128   ;;  %s1173_s13 = smov 8  }
   0xb   :  { %21 = dma.hbm_to_vmem [thread:$0]  %s1820_s1, 4096, %s16_s10, [#allocation3], %s1172_s12, %s1172_s12, %s1173_s13  }
   0xc   :  { %1169 = dma.done.wait [#allocation3], 4096  }
   0xd   :  { %1170 = vsyncadd [#allocation3], 4294963200  ;;  %vm921_vm0 = vcmask 517120   ;;  %v1174_v0 = vmov 0.0   ;;  %v58_v1 = vld [vmem:[#allocation2 + $0xf8] sm:$0xff]  ;;  %v57_v3 = vld [vmem:[#allocation2 + $0xf0] sm:$0xff] }
   0xe   :  { %922 = vst.msk [vmem:[%s1821_s2] sm:$0x3] %vm921_vm0, %v1174_v0  ;;  %925 = vst.msk [vmem:[%s1821_s2 + $0x6] sm:$0x3] %vm921_vm0, %v1174_v0  ;;  %v42_v2 = vld [vmem:[#allocation2 + $0x78] sm:$0xff]  ;;  %v1205_v4 = vand.u32 4294901760, %v58_v1 }
   0xf   :  { %926 = vst.msk [vmem:[%s1821_s2 + $0x8] sm:$0x3] %vm921_vm0, %v1174_v0  ;;  %929 = vst.msk [vmem:[%s1821_s2 + $0xe] sm:$0x3] %vm921_vm0, %v1174_v0  ;;  %v1207_v5 = vand.u32 4294901760, %v42_v2  ;;  %v1209_v6 = vand.u32 4294901760, %v57_v3 }
  0x10   :  { %v41_v7 = vld [vmem:[#allocation2 + $0x70] sm:$0xff]  ;;  %v56_v8 = vld [vmem:[#allocation2 + $0xe8] sm:$0xff]  ;;  %v55_v13 = vld [vmem:[#allocation2 + $0xe0] sm:$0xff]  ;;  %935 = vmatprep.subr.mxu0 %v1205_v4  ;;  %v1225_v19 = vsub.f32 %v58_v1, %v1205_v4  ;;  %vm923_vm1 = vcmask 519168   ;;  %vm927_vm2 = vcmask 523268  }
  0x11   :  { %v40_v9 = vld [vmem:[#allocation2 + $0x68] sm:$0xff]  ;;  %v1211_v10 = vand.u32 4294901760, %v41_v7  ;;  %v1213_v11 = vand.u32 4294901760, %v56_v8  ;;  %v39_v14 = vld [vmem:[#allocation2 + $0x60] sm:$0xff]  ;;  %v54_v15 = vld [vmem:[#allocation2 + $0xd8] sm:$0xff]  ;;  %v1218_v16 = vand.u32 4294901760, %v55_v13  ;;  %936 = vmatpush3.msra.mxu0 %v1207_v5  ;;  %v1238_v24 = vsub.f32 %v42_v2, %v1207_v5 }
  0x12   :  { %v1215_v12 = vand.u32 4294901760, %v40_v9  ;;  %v1220_v17 = vand.u32 4294901760, %v39_v14  ;;  %v1222_v18 = vand.u32 4294901760, %v54_v15  ;;  %v1227_v20 = vld [vmem:[#allocation2 + $0x58] sm:$0xff]  ;;  %v1229_v21 = vld [vmem:[#allocation2 + $0xd0] sm:$0xff]  ;;  %v1244_v26 = vsub.f32 %v57_v3, %v1209_v6  ;;  %v1246_v27 = vld [vmem:[#allocation2 + $0xc8] sm:$0xff]  ;;  %937 = vmatprep.subr.mxu0 %v1209_v6 }
  0x13   :  { %v1231_v22 = vld [vmem:[#allocation2 + $0x50] sm:$0xff]  ;;  %v1235_v23 = vand.u32 4294901760, %v1227_v20  ;;  %v1241_v25 = vand.u32 4294901760, %v1229_v21  ;;  %v1248_v28 = vld [vmem:[#allocation2 + $0x48] sm:$0xff]  ;;  %v1250_v29 = vld [vmem:[#allocation2 + $0xc0] sm:$0xff]  ;;  %v1835_v30 = vand.u32 4294901760, %v1225_v19  ;;  %v1258_v32 = vsub.f32 %v41_v7, %v1211_v10  ;;  %938 = vmatpush3.msra.mxu0 %v1211_v10 }
  0x14   :  { %v1255_v31 = vand.u32 4294901760, %v1231_v22  ;;  %v1261_v33 = vand.u32 4294901760, %v1246_v27  ;;  %v1833_v34 = vand.u32 4294901760, %v1238_v24  ;;  %v1832_v35 = vand.u32 4294901760, %v1244_v26  ;;  %v1272_v38 = vld [vmem:[#allocation2 + $0x40] sm:$0xff]  ;;  %939 = vmatprep.subr.mxu0 %v1213_v11  ;;  %v1296_v47 = vld [vmem:[#allocation2 + $0xb8] sm:$0xff] }
  0x15   :  { %v1267_v36 = vsub.f32 %v56_v8, %v1213_v11  ;;  %v1270_v37 = vand.u32 4294901760, %v1248_v28  ;;  %v287_v39 = vsub.f32 %v1225_v19, %v1835_v30  ;;  %v1830_v40 = vand.u32 4294901760, %v1258_v32  ;;  %940 = vmatpush3.msra.mxu0 %v1215_v12  ;;  %v1306_v52 = vld [vmem:[#allocation2 + $0x38] sm:$0xff]  ;;  %v1313_v57 = vld [vmem:[#allocation2 + $0xb0] sm:$0xff]  ;;  %v1337_v3 = vld [vmem:[#allocation2 + $0xa8] sm:$0xff] }
  0x16   :  { %1890 = vst [vmem:[#allocation5_spill] sm:$0xff] %v1255_v31  ;;  %1891 = vst [vmem:[#allocation6_spill] sm:$0xff] %v1261_v33  ;;  %v1280_v41 = vsub.f32 %v40_v9, %v1215_v12  ;;  %v1283_v42 = vand.u32 4294901760, %v1250_v29  ;;  %v175_v43 = vsub.f32 %v1238_v24, %v1833_v34  ;;  %v294_v44 = vsub.f32 %v1244_v26, %v1832_v35  ;;  %v1325_v62 = vld [vmem:[#allocation2 + $0x30] sm:$0xff] }
  0x17   :  { %1892 = vst [vmem:[#allocation7_spill] sm:$0xff] %v1270_v37  ;;  %v1828_v45 = vand.u32 4294901760, %v1267_v36  ;;  %v1294_v46 = vsub.f32 %v55_v13, %v1218_v16  ;;  %941 = vmatprep.subr.mxu0 %v1218_v16  ;;  %v288_v48 = vand.u32 4294901760, %v287_v39  ;;  %v182_v49 = vsub.f32 %v1258_v32, %v1830_v40  ;;  %v1428_v40 = vld [vmem:[#allocation2 + $0x90] sm:$0xff] }
  0x18   :  { %1893 = vst [vmem:[#allocation8_spill] sm:$0xff] %v1283_v42  ;;  %v1827_v50 = vand.u32 4294901760, %v1280_v41  ;;  %v1304_v51 = vand.u32 4294901760, %v1272_v38  ;;  %942 = vmatpush3.msra.mxu0 %v1220_v17  ;;  %v176_v53 = vand.u32 4294901760, %v175_v43  ;;  %v295_v54 = vand.u32 4294901760, %v294_v44  ;;  %v1438_v35 = vld [vmem:[#allocation2 + $0x10] sm:$0xff] }
  0x19   :  { %v301_v55 = vsub.f32 %v1267_v36, %v1828_v45  ;;  %v1825_v56 = vand.u32 4294901760, %v1294_v46  ;;  %943 = vmatprep.subr.mxu0 %v1222_v18  ;;  %970 = vmatprep.subr.mxu1 %v288_v48  ;;  %v183_v58 = vand.u32 4294901760, %v182_v49  ;;  %v1320_v60 = vsub.f32 %v39_v14, %v1220_v17  ;;  %v1348_v14 = vld [vmem:[#allocation2 + $0x28] sm:$0xff] }
  0x1a   :  { %1894 = vst [vmem:[#allocation9_spill] sm:$0xff] %v1304_v51  ;;  %v189_v59 = vsub.f32 %v1280_v41, %v1827_v50  ;;  %v1323_v61 = vand.u32 4294901760, %v1296_v47  ;;  %944 = vmatpush3.msra.mxu0 %v1235_v23  ;;  %971 = vmatpush3.msra.mxu1 %v176_v53  ;;  %v1332_v1 = vsub.f32 %v54_v15, %v1222_v18  ;;  %v1335_v2 = vand.u32 4294901760, %v1306_v52  ;;  %v1415_v50 = vld [vmem:[#allocation2 + $0x18] sm:$0xff] }
  0x1b   :  { %v302_v63 = vand.u32 4294901760, %v301_v55  ;;  %v308_v0 = vsub.f32 %v1294_v46, %v1825_v56  ;;  %945 = vmatprep.subr.mxu0 %v1241_v25  ;;  %972 = vmatprep.subr.mxu1 %v295_v54  ;;  %v1823_v8 = vand.u32 4294901760, %v1320_v60  ;;  %v1343_v9 = vsub.f32 %v1227_v20, %v1235_v23 }
  0x1c   :  { %1895 = vst [vmem:[#allocation10_spill] sm:$0xff] %v1323_v61  ;;  %1896 = vst [vmem:[#allocation11_spill] sm:$0xff] %v1335_v2  ;;  %v190_v7 = vand.u32 4294901760, %v189_v59  ;;  %v1346_v13 = vand.u32 4294901760, %v1313_v57  ;;  %946 = vmatpush3.msra.mxu0 %v1255_v31  ;;  %973 = vmatpush3.msra.mxu1 %v183_v58  ;;  %v1822_v39 = vand.u32 4294901760, %v1332_v1  ;;  %v1354_v43 = vsub.f32 %v1229_v21, %v1241_v25  ;;  %v1371_v21 = vld [vmem:[#allocation2 + $0xa0] sm:$0xff] }
  0x1d   :  { %v309_v15 = vand.u32 4294901760, %v308_v0  ;;  %v1357_v44 = vand.u32 4294901760, %v1325_v62  ;;  %947 = vmatprep.subr.mxu0 %v1261_v33  ;;  %974 = vmatprep.subr.mxu1 %v302_v63  ;;  %v196_v20 = vsub.f32 %v1320_v60, %v1823_v8  ;;  %v1824_v48 = vand.u32 4294901760, %v1343_v9 }
  0x1e   :  { %1897 = vst [vmem:[#allocation12_spill] sm:$0xff] %v1346_v13  ;;  %v1366_v49 = vsub.f32 %v1231_v22, %v1255_v31  ;;  %v1369_v53 = vand.u32 4294901760, %v1337_v3  ;;  %948 = vmatpush3.msra.mxu0 %v1270_v37  ;;  %975 = vmatpush3.msra.mxu1 %v190_v7  ;;  %v315_v54 = vsub.f32 %v1332_v1, %v1822_v39  ;;  %v1826_v55 = vand.u32 4294901760, %v1354_v43  ;;  %v1394_v39 = vld [vmem:[#allocation2 + $0x20] sm:$0xff] }
  0x1f   :  { %1898 = vst [vmem:[#allocation13_spill] sm:$0xff] %v1357_v44  ;;  %v1380_v58 = vsub.f32 %v1246_v27, %v1261_v33  ;;  %v1383_v22 = vand.u32 4294901760, %v1348_v14  ;;  %949 = vmatprep.subr.mxu0 %v1283_v42  ;;  %976 = vmatprep.subr.mxu1 %v309_v15  ;;  %v197_v59 = vand.u32 4294901760, %v196_v20  ;;  %v203_v63 = vsub.f32 %v1343_v9, %v1824_v48  ;;  %v1404_v48 = vld [vmem:[#allocation2 + $0x98] sm:$0xff] }
  0x20   :  { %1899 = vst [vmem:[#allocation14_spill] sm:$0xff] %v1369_v53  ;;  %v1829_v0 = vand.u32 4294901760, %v1366_v49  ;;  %v1392_v7 = vsub.f32 %v1248_v28, %v1270_v37  ;;  %950 = vmatpush3.msra.mxu0 %v1304_v51  ;;  %v316_v27 = vand.u32 4294901760, %v315_v54  ;;  %v322_v15 = vsub.f32 %v1354_v43, %v1826_v55 }
  0x21   :  { %1900 = vst [vmem:[#allocation15_spill] sm:$0xff] %v1383_v22  ;;  %v1831_v20 = vand.u32 4294901760, %v1380_v58  ;;  %v1402_v8 = vand.u32 4294901760, %v1371_v21  ;;  %977 = vmatpush3.msra.mxu1 %v197_v59  ;;  %951 = vmatprep.subr.mxu0 %v1323_v61  ;;  %v204_v28 = vand.u32 4294901760, %v203_v63  ;;  %v1413_v55 = vsub.f32 %v1250_v29, %v1283_v42 }
  0x22   :  { %v210_v56 = vsub.f32 %v1366_v49, %v1829_v0  ;;  %v1834_v54 = vand.u32 4294901760, %v1392_v7  ;;  %978 = vmatprep.subr.mxu1 %v316_v27  ;;  %952 = vmatpush3.msra.mxu0 %v1335_v2  ;;  %v323_v45 = vand.u32 4294901760, %v322_v15  ;;  %v1422_v63 = vand.u32 4294901760, %v1394_v39 }
  0x23   :  { %1901 = vst [vmem:[#allocation16_spill] sm:$0xff] %v1402_v8  ;;  %v329_v59 = vsub.f32 %v1380_v58, %v1831_v20  ;;  %v1426_v0 = vsub.f32 %v1272_v38, %v1304_v51  ;;  %979 = vmatpush3.msra.mxu1 %v204_v28  ;;  %953 = vmatprep.subr.mxu0 %v1346_v13  ;;  %v1838_v15 = vand.u32 4294901760, %v1413_v55  ;;  %v1436_v20 = vand.u32 4294901760, %v1404_v48 }
  0x24   :  { %1902 = vst [vmem:[#allocation17_spill] sm:$0xff] %v1422_v63  ;;  %v211_v29 = vand.u32 4294901760, %v210_v56  ;;  %v217_v27 = vsub.f32 %v1392_v7, %v1834_v54  ;;  %980 = vmatprep.subr.mxu1 %v323_v45  ;;  %954 = vmatpush3.msra.mxu0 %v1357_v44  ;;  %v1444_v56 = vsub.f32 %v1296_v47, %v1323_v61  ;;  %v1447_v34 = vand.u32 4294901760, %v1415_v50  ;;  %v1449_v54 = vld [vmem:[#allocation2 + $0x88] sm:$0xff] }
  0x25   :  { %v330_v38 = vand.u32 4294901760, %v329_v59  ;;  %v1841_v28 = vand.u32 4294901760, %v1426_v0  ;;  %955 = vmatprep.subr.mxu0 %v1369_v53  ;;  %v336_v45 = vsub.f32 %v1413_v55, %v1838_v15  ;;  %v1457_v59 = vsub.f32 %v1306_v52, %v1335_v2  ;;  %v1474_v52 = vld [vmem:[#allocation2 + $0x8] sm:$0xff] }
  0x26   :  { %1903 = vst [vmem:[#allocation18_spill] sm:$0xff] %v1447_v34  ;;  %981 = vmatpush3.msra.mxu1 %v211_v29  ;;  %v218_v30 = vand.u32 4294901760, %v217_v27  ;;  %v1460_v47 = vand.u32 4294901760, %v1428_v40  ;;  %956 = vmatpush3.msra.mxu0 %v1383_v22  ;;  %v1469_v61 = vsub.f32 %v1313_v57, %v1346_v13  ;;  %v1472_v15 = vand.u32 4294901760, %v1438_v35  ;;  %v1485_v57 = vld [vmem:[#allocation2 + $0x80] sm:$0xff] }
  0x27   :  { %982 = vmatprep.subr.mxu1 %v330_v38  ;;  %v224_v29 = vsub.f32 %v1426_v0, %v1841_v28  ;;  %957 = vmatprep.subr.mxu0 %v1402_v8  ;;  %v337_v38 = vand.u32 4294901760, %v336_v45  ;;  %v1480_v28 = vsub.f32 %v1325_v62, %v1357_v44  ;;  %v1483_v27 = vand.u32 4294901760, %v1449_v54  ;;  %v1508_v45 = vld [vmem:[#allocation2] sm:$0xff] }
  0x28   :  { %1904 = vst [vmem:[#allocation19_spill] sm:$0xff] %v1460_v47  ;;  %1905 = vst [vmem:[#allocation20_spill] sm:$0xff] %v1472_v15  ;;  %983 = vmatpush3.msra.mxu1 %v218_v30  ;;  %958 = vmatpush3.msra.mxu0 %v1422_v63  ;;  %v1908_v51 = vand.u32 4294901760, %v1444_v56  ;;  %v1494_v2 = vsub.f32 %v1337_v3, %v1369_v53  ;;  %v1910_v62 = vand.u32 4294901760, %v1457_v59  ;;  %v1516_v42 = vand.u32 4294901760, %v1485_v57 }
  0x29   :  { %1906 = vst [vmem:[#allocation21_spill] sm:$0xff] %v1480_v28  ;;  %1907 = vst [vmem:[#allocation22_spill] sm:$0xff] %v1483_v27  ;;  %v225_v13 = vand.u32 4294901760, %v224_v29  ;;  %984 = vmatprep.subr.mxu1 %v337_v38  ;;  %959 = vmatprep.subr.mxu0 %v1436_v20  ;;  %v1502_v29 = vand.u32 4294901760, %v1474_v52  ;;  %v1911_v38 = vand.u32 4294901760, %v1469_v61  ;;  %v1542_v37 = vsub.f32 %v1394_v39, %v1422_v63 }
  0x2a   :  { %v343_v30 = vsub.f32 %v1444_v56, %v1908_v51  ;;  %1909 = vst [vmem:[#allocation23_spill] sm:$0xff] %v1494_v2  ;;  %v231_v44 = vsub.f32 %v1457_v59, %v1910_v62  ;;  %v1506_v51 = vsub.f32 %v1348_v14, %v1383_v22  ;;  %960 = vmatpush3.msra.mxu0 %v1447_v34  ;;  %v26_v14 = vld [vmem:[%s1819_s0 + $0x8] sm:$0xff]  ;;  %v25_v62 = vld [vmem:[%s1819_s0] sm:$0xff] }
  0x2b   :  { %985 = vmatpush3.msra.mxu1 %v225_v13  ;;  %v350_v53 = vsub.f32 %v1469_v61, %v1911_v38  ;;  %961 = vmatprep.subr.mxu0 %v1460_v47  ;;  %v1912_v13 = vand.u32 4294901760, %v1480_v28  ;;  %v1528_v38 = vsub.f32 %v1371_v21, %v1402_v8  ;;  %v1555_v39 = vsub.f32 %v1404_v48, %v1436_v20 }
  0x2c   :  { %v344_v3 = vand.u32 4294901760, %v343_v30  ;;  %v232_v22 = vand.u32 4294901760, %v231_v44  ;;  %962 = vmatpush3.msra.mxu0 %v1472_v15  ;;  %v1913_v44 = vand.u32 4294901760, %v1494_v2 }
  0x2d   :  { %v238_v30 = vsub.f32 %v1480_v28, %v1912_v13  ;;  %v351_v33 = vand.u32 4294901760, %v350_v53  ;;  %v1538_v13 = vand.u32 4294901760, %v1508_v45  ;;  %963 = vmatprep.subr.mxu0 %v1483_v27  ;;  %v1866_v8 = vand.u32 4294901760, %v1528_v38 }
  0x2e   :  { %986 = vmatprep.subr.mxu1 %v344_v3  ;;  %v357_v31 = vsub.f32 %v1494_v2, %v1913_v44  ;;  %v1914_v3 = vand.u32 4294901760, %v1506_v51  ;;  %v1549_v28 = vand.u32 4294901760, %v26_v14  ;;  %964 = vmatpush3.msra.mxu0 %v1502_v29  ;;  %v1867_v2 = vand.u32 4294901760, %v1542_v37 }
  0x2f   :  { %987 = vmatpush3.msra.mxu1 %v232_v22  ;;  %v239_v21 = vand.u32 4294901760, %v238_v30  ;;  %v1557_v22 = vand.u32 4294901760, %v25_v62  ;;  %965 = vmatprep.subr.mxu0 %v1516_v42 }
  0x30   :  { %v245_v53 = vsub.f32 %v1506_v51, %v1914_v3  ;;  %1915 = vst [vmem:[#allocation24_spill] sm:$0xff] %v1549_v28  ;;  %988 = vmatprep.subr.mxu1 %v351_v33  ;;  %v358_v44 = vand.u32 4294901760, %v357_v31  ;;  %v364_v3 = vsub.f32 %v1528_v38, %v1866_v8  ;;  %v1564_v31 = vsub.f32 %v26_v14, %v1549_v28 }
  0x31   :  { %1916 = vst [vmem:[#allocation25_spill] sm:$0xff] %v1557_v22  ;;  %989 = vmatpush3.msra.mxu1 %v239_v21  ;;  %v1568_v33 = vsub.f32 %v1415_v50, %v1447_v34  ;;  %966 = vmatpush3.msra.mxu0 %v1538_v13  ;;  %v252_v48 = vsub.f32 %v1542_v37, %v1867_v2 }
  0x32   :  { %v246_v30 = vand.u32 4294901760, %v245_v53  ;;  %990 = vmatprep.subr.mxu1 %v358_v44  ;;  %v1576_v53 = vsub.f32 %v25_v62, %v1557_v22  ;;  %v1580_v14 = vsub.f32 %v1428_v40, %v1460_v47  ;;  %v365_v8 = vand.u32 4294901760, %v364_v3  ;;  %1005 = vmatprep.subr.mxu0 %v1225_v19 }
  0x33   :  { %v1872_v50 = vand.u32 4294901760, %v1564_v31  ;;  %v1875_v44 = vand.u32 4294901760, %v1568_v33  ;;  %v1587_v2 = vsub.f32 %v1438_v35, %v1472_v15  ;;  %v253_v21 = vand.u32 4294901760, %v252_v48  ;;  %396 = vmatprep.mubr.f32.mxu1 %v1549_v28 }
  0x34   :  { %991 = vmatpush3.msra.mxu1 %v246_v30  ;;  %v1917_v62 = vand.u32 4294901760, %v1555_v39  ;;  %v1918_v30 = vand.u32 4294901760, %v1576_v53  ;;  %v1919_v28 = vand.u32 4294901760, %v1580_v14  ;;  %v1614_v15 = vsub.f32 %v1474_v52, %v1502_v29 }
  0x35   :  { %992 = vmatprep.subr.mxu1 %v365_v8  ;;  %v158_v3 = vsub.f32 %v1564_v31, %v1872_v50  ;;  %v259_v35 = vsub.f32 %v1568_v33, %v1875_v44  ;;  %v1921_v47 = vand.u32 4294901760, %v1587_v2 }
  0x36   :  { %v371_v34 = vsub.f32 %v1555_v39, %v1917_v62  ;;  %v1604_v62 = vsub.f32 %v1449_v54, %v1483_v27  ;;  %993 = vmatpush3.msra.mxu1 %v253_v21  ;;  %v164_v8 = vsub.f32 %v1576_v53, %v1918_v30  ;;  %v378_v50 = vsub.f32 %v1580_v14, %v1919_v28 }
  0x37   :  { %1920 = vst [vmem:[#allocation26_spill] sm:$0xff] %v1614_v15  ;;  %v159_v44 = vand.u32 4294901760, %v158_v3  ;;  %v260_v48 = vand.u32 4294901760, %v259_v35  ;;  %v266_v54 = vsub.f32 %v1587_v2, %v1921_v47  ;;  %v1882_v30 = vand.u32 4294901760, %v1614_v15 }
  0x38   :  { %v372_v40 = vand.u32 4294901760, %v371_v34  ;;  %v1883_v34 = vand.u32 4294901760, %v1604_v62  ;;  %v165_v21 = vand.u32 4294901760, %v164_v8  ;;  %v379_v27 = vand.u32 4294901760, %v378_v50 }
  0x39   :  { %v1623_v28 = vsub.f32 %v1485_v57, %v1516_v42  ;;  %160 = vmatprep.mubr.f32.mxu0 %v159_v44  ;;  %v267_v52 = vand.u32 4294901760, %v266_v54  ;;  %v1630_v47 = vsub.f32 %v1508_v45, %v1538_v13  ;;  %v273_v50 = vsub.f32 %v1614_v15, %v1882_v30  ;;  %v1924_v54 = vld [vmem:[#allocation21_spill] sm:$0xff]  ;;  %v1937_v30 = vld [vmem:[#allocation16_spill] sm:$0xff] }
  0x3a   :  { %994 = vmatprep.subr.mxu1 %v372_v40  ;;  %v385_v3 = vsub.f32 %v1604_v62, %v1883_v34  ;;  %166 = vmatmul.mubr.f32.vlgmr.msra.gmra.mxu0 %v165_v21  ;;  %v1925_v21 = vld [vmem:[#allocation5_spill] sm:$0xff]  ;;  %v1938_v34 = vand.u32 4294901760, %v1225_v19  ;;  %v1946_v19 = vand.u32 4294901760, %v1267_v36 }
  0x3b   :  { %1922 = vst [vmem:[#allocation27_spill] sm:$0xff] %v1623_v28  ;;  %995 = vmatpush3.msra.mxu1 %v260_v48  ;;  %1923 = vst [vmem:[#allocation28_spill] sm:$0xff] %v1630_v47  ;;  %v1881_v57 = vand.u32 4294901760, %v1623_v28  ;;  %1006 = vmatpush3.msra.mxu0 %v1238_v24  ;;  %v1880_v40 = vand.u32 4294901760, %v1630_v47  ;;  %v274_v35 = vand.u32 4294901760, %v273_v50  ;;  %v1928_v50 = vld [vmem:[#allocation7_spill] sm:$0xff] }
  0x3c   :  { %996 = vmatprep.subr.mxu1 %v379_v27  ;;  %v386_v44 = vand.u32 4294901760, %v385_v3  ;;  %1007 = vmatprep.subr.mxu0 %v1244_v26  ;;  %v1927_v3 = vld [vmem:[#allocation6_spill] sm:$0xff] }
  0x3d   :  { %997 = vmatpush3.msra.mxu1 %v267_v52  ;;  %v392_v45 = vsub.f32 %v1623_v28, %v1881_v57  ;;  %533 = vmatprep.mubr.f32.mxu0 %v1564_v31  ;;  %v280_v27 = vsub.f32 %v1630_v47, %v1880_v40  ;;  %v1926_v52 = vld [vmem:[#allocation23_spill] sm:$0xff]  ;;  %v1935_v40 = vld [vmem:[#allocation14_spill] sm:$0xff] }
  0x3e   :  { %1008 = vmatpush3.msra.mxu0 %v1258_v32  ;;  %998 = vmatprep.subr.mxu1 %v386_v44  ;;  %v1929_v44 = vld [vmem:[#allocation8_spill] sm:$0xff]  ;;  %v1936_v57 = vld [vmem:[#allocation15_spill] sm:$0xff] }
  0x3f   :  { %1009 = vmatprep.subr.mxu0 %v1267_v36  ;;  %999 = vmatpush3.msra.mxu1 %v274_v35  ;;  %v393_v48 = vand.u32 4294901760, %v392_v45  ;;  %v281_v8 = vand.u32 4294901760, %v280_v27  ;;  %v1930_v35 = vld [vmem:[#allocation9_spill] sm:$0xff]  ;;  %v1931_v45 = vld [vmem:[#allocation10_spill] sm:$0xff]  ;;  %v1932_v27 = vld [vmem:[#allocation11_spill] sm:$0xff]  ;;  %v1951_v36 = vand.u32 4294901760, %v1576_v53 }
  0x40   :  { %1010 = vmatpush3.msra.mxu0 %v1280_v41 }
  0x41   :  { %1000 = vmatprep.subr.mxu1 %v393_v48  ;;  %1011 = vmatprep.subr.mxu0 %v1294_v46  ;;  %v1933_v48 = vld [vmem:[#allocation12_spill] sm:$0xff] }
  0x42   :  { %1001 = vmatpush3.msra.mxu1 %v281_v8  ;;  %1012 = vmatpush3.msra.mxu0 %v1320_v60  ;;  %v1934_v8 = vld [vmem:[#allocation13_spill] sm:$0xff] }
  0x43   :  { %398 = vmatmul.mubr.f32.vlgmr.msra.gmra.mxu1 %v1557_v22  ;;  %1013 = vmatprep.subr.mxu0 %v1332_v1  ;;  %v1939_v22 = vld [vmem:[#allocation18_spill] sm:$0xff] }
  0x44   :  { %1040 = vmatprep.subr.mxu1 %v1205_v4  ;;  %1014 = vmatpush3.msra.mxu0 %v1343_v9 }
  0x45   :  { %1041 = vmatpush3.msra.mxu1 %v1207_v5  ;;  %1015 = vmatprep.subr.mxu0 %v1354_v43 }
  0x46   :  { %1042 = vmatprep.subr.mxu1 %v1209_v6  ;;  %1016 = vmatpush3.msra.mxu0 %v1366_v49 }
  0x47   :  { %1043 = vmatpush3.msra.mxu1 %v1211_v10  ;;  %1017 = vmatprep.subr.mxu0 %v1380_v58 }
  0x48   :  { %1044 = vmatprep.subr.mxu1 %v1213_v11  ;;  %1018 = vmatpush3.msra.mxu0 %v1392_v7 }
  0x49   :  { %1045 = vmatpush3.msra.mxu1 %v1215_v12  ;;  %1019 = vmatprep.subr.mxu0 %v1413_v55 }
  0x4a   :  { %1046 = vmatprep.subr.mxu1 %v1218_v16  ;;  %1020 = vmatpush3.msra.mxu0 %v1426_v0 }
  0x4b   :  { %1047 = vmatpush3.msra.mxu1 %v1220_v17  ;;  %1021 = vmatprep.subr.mxu0 %v1444_v56 }
  0x4c   :  { %1048 = vmatprep.subr.mxu1 %v1222_v18  ;;  %1022 = vmatpush3.msra.mxu0 %v1457_v59 }
  0x4d   :  { %1049 = vmatpush3.msra.mxu1 %v1235_v23  ;;  %1023 = vmatprep.subr.mxu0 %v1469_v61 }
  0x4e   :  { %1050 = vmatprep.subr.mxu1 %v1241_v25  ;;  %1024 = vmatpush3.msra.mxu0 %v1924_v54 }
  0x4f   :  { %1051 = vmatpush3.msra.mxu1 %v1925_v21  ;;  %1025 = vmatprep.subr.mxu0 %v1926_v52 }
  0x50   :  { %1052 = vmatprep.subr.mxu1 %v1927_v3  ;;  %1026 = vmatpush3.msra.mxu0 %v1506_v51 }
  0x51   :  { %1053 = vmatpush3.msra.mxu1 %v1928_v50  ;;  %1027 = vmatprep.subr.mxu0 %v1528_v38 }
  0x52   :  { %1054 = vmatprep.subr.mxu1 %v1929_v44  ;;  %1028 = vmatpush3.msra.mxu0 %v1542_v37 }
  0x53   :  { %1055 = vmatpush3.msra.mxu1 %v1930_v35  ;;  %1029 = vmatprep.subr.mxu0 %v1555_v39 }
  0x54   :  { %1056 = vmatprep.subr.mxu1 %v1931_v45  ;;  %1030 = vmatpush3.msra.mxu0 %v1568_v33 }
  0x55   :  { %1057 = vmatpush3.msra.mxu1 %v1932_v27  ;;  %1031 = vmatprep.subr.mxu0 %v1580_v14 }
  0x56   :  { %1058 = vmatprep.subr.mxu1 %v1933_v48  ;;  %1032 = vmatpush3.msra.mxu0 %v1587_v2 }
  0x57   :  { %1059 = vmatpush3.msra.mxu1 %v1934_v8  ;;  %1033 = vmatprep.subr.mxu0 %v1604_v62 }
  0x58   :  { %1060 = vmatprep.subr.mxu1 %v1935_v40  ;;  %1034 = vmatpush3.msra.mxu0 %v1614_v15  ;;  %v1940_v15 = vand.u32 4294901760, %v1238_v24  ;;  %v1947_v24 = vand.u32 4294901760, %v1280_v41  ;;  %v1953_v41 = vand.u32 4294901760, %v1343_v9  ;;  %v1969_v9 = vand.u32 4294901760, %v1568_v33 }
  0x59   :  { %1061 = vmatpush3.msra.mxu1 %v1936_v57  ;;  %1035 = vmatprep.subr.mxu0 %v1623_v28  ;;  %v1941_v57 = vld [vmem:[#allocation19_spill] sm:$0xff]  ;;  %v1945_v28 = vld [vmem:[#allocation22_spill] sm:$0xff] }
  0x5a   :  { %1062 = vmatprep.subr.mxu1 %v1937_v30  ;;  %1036 = vmatpush3.msra.mxu0 %v1630_v47  ;;  %v1942_v30 = vand.u32 4294901760, %v1244_v26  ;;  %v1943_v47 = vld [vmem:[#allocation20_spill] sm:$0xff]  ;;  %v1948_v26 = vand.u32 4294901760, %v1294_v46  ;;  %v1954_v46 = vand.u32 4294901760, %v1354_v43  ;;  %v1970_v43 = vand.u32 4294901760, %v1580_v14 }
  0x5b   :  { %1063 = vmatpush3.msra.mxu1 %v1422_v63  ;;  %536 = vmatmul.mubr.f32.vlgmr.msra.gmra.mxu0 %v1576_v53  ;;  %v1944_v63 = vand.u32 4294901760, %v1258_v32  ;;  %v1949_v32 = vand.u32 4294901760, %v1564_v31  ;;  %v1983_v31 = vld [vmem:[#allocation25_spill] sm:$0xff] }
  0x5c   :  { %1064 = vmatprep.subr.mxu1 %v1436_v20  ;;  %1075 = vmatprep.subr.mxu0 %v1938_v34 }
  0x5d   :  { %1065 = vmatpush3.msra.mxu1 %v1939_v22  ;;  %1076 = vmatpush3.msra.mxu0 %v1940_v15  ;;  %v1952_v15 = vand.u32 4294901760, %v1332_v1  ;;  %v1956_v1 = vand.u32 4294901760, %v1380_v58 }
  0x5e   :  { %1066 = vmatprep.subr.mxu1 %v1941_v57  ;;  %1077 = vmatprep.subr.mxu0 %v1942_v30 }
  0x5f   :  { %1067 = vmatpush3.msra.mxu1 %v1943_v47  ;;  %1078 = vmatpush3.msra.mxu0 %v1944_v63  ;;  %v1950_v63 = vand.u32 4294901760, %v1320_v60  ;;  %v1955_v60 = vand.u32 4294901760, %v1366_v49  ;;  %v1972_v49 = vand.u32 4294901760, %v1604_v62 }
  0x60   :  { %1068 = vmatprep.subr.mxu1 %v1945_v28  ;;  %1079 = vmatprep.subr.mxu0 %v1946_v19 }
  0x61   :  { %1069 = vmatpush3.msra.mxu1 %v1502_v29  ;;  %1080 = vmatpush3.msra.mxu0 %v1947_v24 }
  0x62   :  { %1070 = vmatprep.subr.mxu1 %v1516_v42  ;;  %1081 = vmatprep.subr.mxu0 %v1948_v26 }
  0x63   :  { %1071 = vmatpush3.msra.mxu1 %v1538_v13  ;;  %640 = vmatprep.mubr.f32.mxu1 %v1949_v32 }
  0x64   :  { %1082 = vmatpush3.msra.mxu0 %v1950_v63  ;;  %644 = vmatmul.mubr.f32.vlgmr.msra.gmra.mxu1 %v1951_v36 }
  0x65   :  { %1083 = vmatprep.subr.mxu0 %v1952_v15  ;;  %1110 = vmatprep.subr.mxu1 %v1205_v4  ;;  %v1957_v4 = vand.u32 4294901760, %v1392_v7  ;;  %v1976_v7 = vld [vmem:[#allocation27_spill] sm:$0xff] }
  0x66   :  { %1084 = vmatpush3.msra.mxu0 %v1953_v41  ;;  %1111 = vmatpush3.msra.mxu1 %v1207_v5  ;;  %v1958_v5 = vand.u32 4294901760, %v1413_v55  ;;  %v1973_v55 = vld [vmem:[#allocation26_spill] sm:$0xff] }
  0x67   :  { %1085 = vmatprep.subr.mxu0 %v1954_v46  ;;  %1112 = vmatprep.subr.mxu1 %v1209_v6  ;;  %v1959_v6 = vand.u32 4294901760, %v1426_v0  ;;  %v1974_v58 = vand.u32 4294901760, %v1973_v55  ;;  %v1975_v0 = vld [vmem:[#allocation15_spill] sm:$0xff] }
  0x68   :  { %1086 = vmatpush3.msra.mxu0 %v1955_v60  ;;  %1113 = vmatpush3.msra.mxu1 %v1211_v10  ;;  %v1960_v10 = vand.u32 4294901760, %v1444_v56  ;;  %v1977_v56 = vand.u32 4294901760, %v1976_v7 }
  0x69   :  { %1087 = vmatprep.subr.mxu0 %v1956_v1  ;;  %1114 = vmatprep.subr.mxu1 %v1213_v11  ;;  %v1961_v11 = vand.u32 4294901760, %v1457_v59  ;;  %v1978_v59 = vld [vmem:[#allocation16_spill] sm:$0xff] }
  0x6a   :  { %1088 = vmatpush3.msra.mxu0 %v1957_v4  ;;  %1115 = vmatpush3.msra.mxu1 %v1215_v12  ;;  %v1962_v12 = vand.u32 4294901760, %v1469_v61  ;;  %v1968_v61 = vand.u32 4294901760, %v1555_v39  ;;  %v1982_v39 = vld [vmem:[#allocation17_spill] sm:$0xff] }
  0x6b   :  { %1089 = vmatprep.subr.mxu0 %v1958_v5  ;;  %1116 = vmatprep.subr.mxu1 %v1218_v16  ;;  %v1963_v16 = vand.u32 4294901760, %v1924_v54 }
  0x6c   :  { %1090 = vmatpush3.msra.mxu0 %v1959_v6  ;;  %1117 = vmatpush3.msra.mxu1 %v1220_v17  ;;  %v1964_v17 = vand.u32 4294901760, %v1926_v52 }
  0x6d   :  { %1091 = vmatprep.subr.mxu0 %v1960_v10  ;;  %1118 = vmatprep.subr.mxu1 %v1222_v18  ;;  %v1965_v18 = vand.u32 4294901760, %v1506_v51  ;;  %v1979_v51 = vld [vmem:[#allocation28_spill] sm:$0xff] }
  0x6e   :  { %1092 = vmatpush3.msra.mxu0 %v1961_v11  ;;  %1119 = vmatpush3.msra.mxu1 %v1235_v23  ;;  %v1966_v23 = vand.u32 4294901760, %v1528_v38  ;;  %v1981_v38 = vld [vmem:[#allocation24_spill] sm:$0xff] }
  0x6f   :  { %1093 = vmatprep.subr.mxu0 %v1962_v12  ;;  %1120 = vmatprep.subr.mxu1 %v1241_v25  ;;  %v1967_v25 = vand.u32 4294901760, %v1542_v37  ;;  %v1971_v37 = vand.u32 4294901760, %v1587_v2  ;;  %v1980_v2 = vand.u32 4294901760, %v1979_v51 }
  0x70   :  { %1094 = vmatpush3.msra.mxu0 %v1963_v16  ;;  %1121 = vmatpush3.msra.mxu1 %v1925_v21 }
  0x71   :  { %1095 = vmatprep.subr.mxu0 %v1964_v17  ;;  %1122 = vmatprep.subr.mxu1 %v1927_v3 }
  0x72   :  { %1096 = vmatpush3.msra.mxu0 %v1965_v18  ;;  %1123 = vmatpush3.msra.mxu1 %v1928_v50 }
  0x73   :  { %1097 = vmatprep.subr.mxu0 %v1966_v23  ;;  %1124 = vmatprep.subr.mxu1 %v1929_v44 }
  0x74   :  { %1098 = vmatpush3.msra.mxu0 %v1967_v25  ;;  %1125 = vmatpush3.msra.mxu1 %v1930_v35 }
  0x75   :  { %1099 = vmatprep.subr.mxu0 %v1968_v61  ;;  %1126 = vmatprep.subr.mxu1 %v1931_v45 }
  0x76   :  { %1100 = vmatpush3.msra.mxu0 %v1969_v9  ;;  %1127 = vmatpush3.msra.mxu1 %v1932_v27 }
  0x77   :  { %1101 = vmatprep.subr.mxu0 %v1970_v43  ;;  %1128 = vmatprep.subr.mxu1 %v1933_v48 }
  0x78   :  { %1102 = vmatpush3.msra.mxu0 %v1971_v37  ;;  %1129 = vmatpush3.msra.mxu1 %v1934_v8 }
  0x79   :  { %1103 = vmatprep.subr.mxu0 %v1972_v49  ;;  %1130 = vmatprep.subr.mxu1 %v1935_v40 }
  0x7a   :  { %1104 = vmatpush3.msra.mxu0 %v1974_v58  ;;  %1131 = vmatpush3.msra.mxu1 %v1975_v0 }
  0x7b   :  { %1105 = vmatprep.subr.mxu0 %v1977_v56  ;;  %1132 = vmatprep.subr.mxu1 %v1978_v59 }
  0x7c   :  { %1106 = vmatpush3.msra.mxu0 %v1980_v2  ;;  %810 = vmatprep.mubr.f32.mxu0 %v1981_v38 }
  0x7d   :  { %1133 = vmatpush3.msra.mxu1 %v1982_v39  ;;  %812 = vmatmul.mubr.f32.vlgmr.msra.gmra.mxu0 %v1983_v31 }
  0x7e   :  { %1134 = vmatprep.subr.mxu1 %v1436_v20  ;;  %914 = vmatprep.mubr.f32.mxu1 %v1981_v38 }
  0x7f   :  { %1135 = vmatpush3.msra.mxu1 %v1939_v22 }
  0x80   :  { %1136 = vmatprep.subr.mxu1 %v1941_v57 }
  0x81   :  { %1137 = vmatpush3.msra.mxu1 %v1943_v47 }
  0x82   :  { %1138 = vmatprep.subr.mxu1 %v1945_v28 }
  0x83   :  { %1139 = vmatpush3.msra.mxu1 %v1502_v29 }
  0x84   :  { %1140 = vmatprep.subr.mxu1 %v1516_v42 }
  0x85   :  { %1141 = vmatpush3.msra.mxu1 %v1538_v13 }
  0x86   :  { %916 = vmatmul.mubr.f32.vlgmr.msra.gmra.mxu1 %v1983_v31 }
  0xfa   :  { %v967_v33 = vpop.f32.mrf.mxu0 }
  0xfc   :  { %v968_v20 = vpop.f32.mrf.mxu0 }
  0xfd   :  { %v969_v40 = vadd.f32 %v968_v20, %v967_v33 }
 0x103   :  { %v1002_v53 = vpop.f32.mrf.mxu1 }
 0x105   :  { %v1003_v62 = vpop.f32.mrf.mxu1 }
 0x106   :  { %v1004_v57 = vadd.f32 %v1003_v62, %v1002_v53 }
 0x108   :  { %v400_v29 = vadd.f32 %v1004_v57, %v969_v40 }
 0x11b   :  { %v1037_v14 = vpop.f32.mrf.mxu0 }
 0x11d   :  { %v1038_v22 = vpop.f32.mrf.mxu0 }
 0x11e   :  { %v1039_v28 = vadd.f32 %v1038_v22, %v1037_v14 }
 0x120   :  { %v538_v42 = vadd.f32 %v1039_v28, %v400_v29 }
 0x124   :  { %v1072_v34 = vpop.f32.mrf.mxu1 }
 0x126   :  { %v1073_v47 = vpop.f32.mrf.mxu1 }
 0x127   :  { %v1074_v21 = vadd.f32 %v1073_v47, %v1072_v34 }
 0x129   :  { %v646_v3 = vadd.f32 %v1074_v21, %v538_v42 }
 0x13d   :  { %v1107_v30 = vpop.f32.mrf.mxu0 }
 0x13f   :  { %v1108_v54 = vpop.f32.mrf.mxu0 }
 0x140   :  { %v1109_v52 = vadd.f32 %v1108_v54, %v1107_v30 }
 0x142   :  { %v814_v44 = vadd.f32 %v1109_v52, %v646_v3 }
 0x146   :  { %v1142_v13 = vpop.f32.mrf.mxu1 }
 0x148   :  { %v1143_v50 = vpop.f32.mrf.mxu1 }
 0x149   :  { %v1144_v35 = vadd.f32 %v1143_v50, %v1142_v13 }
 0x14b   :  { %v918_v45 = vadd.f32 %v1144_v35, %v814_v44 }
 0x14d   :  { %924 = vst.msk [vmem:[%s1821_s2 + $0x2] sm:$0xf] %vm923_vm1, %v918_v45 }
 0x14e   :  { %928 = vst.msk [vmem:[%s1821_s2 + $0x6] sm:$0xf0] %vm927_vm2, %v918_v45 }
 0x14f   :  { %934 = vsyncpa [#allocation3], 1 }

</bundles_post_ra>
